<compile_context>
chip_gen: v7x
topology: tpu7x:2x2x1
jax: 0.10.0
libtpu: 0.0.40
codegen_flags: <defaults>
</compile_context>

<pallas_src>
import functools

import jax
import jax.numpy as jnp
from jax.experimental import pallas as pl
from jax.experimental.pallas import tpu as pltpu


def _block_mask_kernel(u_ref, m_ref, *, drop_prob, block_size):
    """u_ref: (1, H, W) f32 uniforms in [0, 1).
    m_ref: (1, H, W) f32 UNSCALED block mask = 1 - maxpool_k(u < gamma)."""
    _, H, W = u_ref.shape
    k = block_size
    pad = k // 2
    gamma = drop_prob / float(k * k)

    # torch.rand(N, H, W) < gamma   (per-N tile)
    seed = (u_ref[...] < gamma).astype(jnp.float32)

    # k x k max pool (stride 1, padding k//2) as two separable 1-D pools of
    # shifted maxima.  Zero fill is equivalent to -inf fill because values are
    # in {0, 1} and every window contains the unshifted element.  Producing
    # only the leading H x W outputs reproduces torch's [:, :, :-1, :-1] crop
    # for even block_size.
    def pool_1d(m, axis):
        size = m.shape[axis]
        out = m                                       # shift s == 0 term
        for d in range(k):
            s = d - pad
            if s == 0 or abs(s) >= size:
                continue
            if s > 0:
                body = jax.lax.slice_in_dim(m, s, size, axis=axis)
                fill = jnp.zeros_like(jax.lax.slice_in_dim(m, 0, s, axis=axis))
                shifted = jnp.concatenate([body, fill], axis=axis)
            else:
                body = jax.lax.slice_in_dim(m, 0, size + s, axis=axis)
                fill = jnp.zeros_like(jax.lax.slice_in_dim(m, 0, -s, axis=axis))
                shifted = jnp.concatenate([fill, body], axis=axis)
            out = jnp.maximum(out, shifted)
        return out

    pooled = pool_1d(pool_1d(seed, axis=2), axis=1)
    m_ref[...] = 1.0 - pooled


def _apply_mask_kernel(scale_ref, m_ref, x_ref, o_ref):
    """scale_ref: (1, 1) f32 in SMEM; m_ref: (1, 1, L) f32 mask row;
    x_ref / o_ref: (1, TC, L) tile of x.  Multiply in f32, cast once."""
    scale = scale_ref[0, 0]
    m = m_ref[...] * scale                            # (1, 1, L) f32
    o_ref[...] = (x_ref[...].astype(jnp.float32) * m).astype(o_ref.dtype)


def _vmem_budget():
    """(per-buffer tile budget, scoped-VMEM limit) sized from the actual chip.

    v5e/v6e (128 MiB physical) -> limit 96 MiB, budget 8 MiB/buffer.
    v7x     ( 64 MiB physical) -> limit 48 MiB, budget 8 MiB/buffer.
    Fallback (query unavailable) uses the v7x-safe numbers.
    """
    try:
        cap = int(getattr(pltpu.get_tpu_info(), "vmem_capacity_bytes", 0)) or (64 << 20)
    except Exception:
        cap = 64 << 20
    limit = min((cap * 3) // 4, 96 << 20)
    budget = min(8 << 20, max(1 << 20, limit // 6))   # in+out double-buffered + slack
    return budget, limit


def _lane_fold(C, HW):
    """Smallest divisor g of C with g*HW >= 128 (1 if HW is already lane-dense).

    Folding g channels into the lane axis keeps output stores dense when the
    spatial extent is smaller than a vreg row (e.g. 7x7 / 8x8 feature maps)."""
    if HW >= 128:
        return 1
    g = C
    for d in range(1, C + 1):
        if C % d == 0 and d * HW >= 128:
            g = d
            break
    return g


def _channel_tile(num_rows, row_bytes, itemsize, n_batch, budget_bytes):
    """Channel rows per block: as large as the per-buffer budget allows,
    sublane-aligned for the dtype (or equal to the full extent), and small
    enough that the grid has >= 2 parallel steps (keeps v7x's 2nd TC busy)."""
    align = max(8, 32 // max(1, itemsize))            # 8 f32 / 16 bf16 / 32 int8
    max_rows = max(1, budget_bytes // max(1, row_bytes))

    if num_rows <= max_rows:
        tc = num_rows                                 # full extent always legal
    else:
        # Alignment takes priority over the budget in the (unrealistic for
        # DropBlock) case max_rows < align; vmem_limit leaves enough slack.
        tc = max(align, (max_rows // align) * align)

    # Guarantee >= 2 grid steps so megacore can shard the stream (v7x).
    while n_batch * pl.cdiv(num_rows, tc) < 2 and tc > align:
        nxt = max(align, ((tc // 2) // align) * align)
        if nxt == tc:
            break
        tc = nxt
    return tc


def dropblock2d(x, key, *, drop_prob, block_size, training=True):
    """DropBlock2D forward.  x: (N, C, H, W) array, key: JAX PRNG key."""
    if (not training) or drop_prob == 0.0:
        return x
    N, C, H, W = x.shape
    HW = H * W

    # torch.rand(x.shape[0], *x.shape[2:])  (host-side PRNG, see TODO above)
    u = jax.random.uniform(key, (N, H, W), dtype=jnp.float32)

    budget, vmem_limit = _vmem_budget()

    # --- kernel 1: unscaled block mask, gridded (and pipelined) over N ---
    block_mask = pl.pallas_call(
        functools.partial(_block_mask_kernel,
                          drop_prob=drop_prob, block_size=block_size),
        out_shape=jax.ShapeDtypeStruct((N, H, W), jnp.float32),
        grid=(N,),
        in_specs=[pl.BlockSpec((1, H, W), lambda n: (n, 0, 0))],
        out_specs=pl.BlockSpec((1, H, W), lambda n: (n, 0, 0)),
        compiler_params=pltpu.CompilerParams(
            dimension_semantics=("parallel",),
            vmem_limit_bytes=int(vmem_limit)),
    )(u)

    # Scalar rescale (torch: * block_mask.numel() / block_mask.sum()), fused
    # into kernel 2 through SMEM.  max(sum, 1) guards all-dropped -> zeros
    # instead of torch's inf/NaN (documented divergence at extreme drop_prob).
    numel = float(N * HW)
    scale = (numel / jnp.maximum(jnp.sum(block_mask), 1.0)).astype(jnp.float32)
    scale_arr = scale.reshape(1, 1)

    # --- kernel 2: lane-dense streaming multiply over (N, C//g, g*H*W) ---
    g = _lane_fold(C, HW)
    CG = C // g
    L = g * HW
    x3 = x.reshape(N, CG, L)                          # contiguous -> free reshape
    m_row = block_mask.reshape(N, 1, HW)
    m3 = m_row if g == 1 else jnp.tile(m_row, (1, 1, g))

    itemsize = jnp.dtype(x.dtype).itemsize
    TC = _channel_tile(CG, max(L, 128) * itemsize, itemsize, N, budget)

    out3 = pl.pallas_call(
        _apply_mask_kernel,
        out_shape=jax.ShapeDtypeStruct((N, CG, L), x.dtype),
        grid=(N, pl.cdiv(CG, TC)),                    # ragged last block is OK
        in_specs=[
            pl.BlockSpec(memory_space=pltpu.MemorySpace.SMEM),   # (1,1) scale
            pl.BlockSpec((1, 1, L), lambda n, c: (n, 0, 0)),     # shared mask row
            pl.BlockSpec((1, TC, L), lambda n, c: (n, c, 0)),    # x tile
        ],
        out_specs=pl.BlockSpec((1, TC, L), lambda n, c: (n, c, 0)),
        compiler_params=pltpu.CompilerParams(
            dimension_semantics=("parallel", "parallel"),
            vmem_limit_bytes=int(vmem_limit)),
    )(scale_arr, m3, x3)
    return out3.reshape(N, C, H, W)


def _reference_dropblock(x, u, drop_prob, block_size):
    """Pure-JAX transcription of the PyTorch module, driven by the same uniforms."""
    gamma = drop_prob / block_size ** 2
    mask = (u < gamma).astype(jnp.float32)
    pad = block_size // 2
    pooled = jax.lax.reduce_window(
        mask, -jnp.inf, jax.lax.max,
        window_dimensions=(1, block_size, block_size),
        window_strides=(1, 1, 1),
        padding=((0, 0), (pad, pad), (pad, pad)))
    if block_size % 2 == 0:
        pooled = pooled[:, :-1, :-1]
    block_mask = 1.0 - pooled
    out = x * block_mask[:, None, :, :]
    return out * block_mask.size / jnp.sum(block_mask)


if __name__ == "__main__":
    root = jax.random.PRNGKey(0)
    kx, km, kx2, km2 = jax.random.split(root, 4)

    # Main config: (2, 4, 16, 16) f32, odd block size, lane-dense H*W = 256.
    N, C, H, W = 2, 4, 16, 16
    drop_prob, block_size = 0.15, 3
    x = jax.random.normal(kx, (N, C, H, W), dtype=jnp.float32)

    out = dropblock2d(x, km, drop_prob=drop_prob, block_size=block_size,
                      training=True)
    out = jax.block_until_ready(out)
    assert out.shape == x.shape and out.dtype == x.dtype
    assert bool(jnp.all(jnp.isfinite(out)))

    # Cross-check against the pure-JAX reference using the same uniforms.
    u = jax.random.uniform(km, (N, H, W), dtype=jnp.float32)
    ref = _reference_dropblock(x, u, drop_prob, block_size)
    assert bool(jnp.allclose(out, ref, rtol=1e-5, atol=1e-5))

    # Second config exercises lane folding (H*W = 64 < 128) and an even
    # block size (torch's [:-1, :-1] crop path): (2, 12, 8, 8).
    N2, C2, H2, W2 = 2, 12, 8, 8
    x2 = jax.random.normal(kx2, (N2, C2, H2, W2), dtype=jnp.float32)
    out2 = jax.block_until_ready(
        dropblock2d(x2, km2, drop_prob=0.3, block_size=2, training=True))
    u2 = jax.random.uniform(km2, (N2, H2, W2), dtype=jnp.float32)
    ref2 = _reference_dropblock(x2, u2, 0.3, 2)
    assert out2.shape == x2.shape and out2.dtype == x2.dtype
    assert bool(jnp.allclose(out2, ref2, rtol=1e-5, atol=1e-5))

    # Eval mode / drop_prob == 0 returns the input unchanged.
    assert bool(jnp.all(dropblock2d(x, km, drop_prob=drop_prob,
                                    block_size=block_size, training=False) == x))

    print("KERNEL_OK")
</pallas_src>

<mosaic_0001>
module attributes {stable_mosaic.version = 11 : i64} {
  func.func @_block_mask_kernel(%arg0: i32, %arg1: memref<1x16x16xf32, #tpu.memory_space<vmem>>, %arg2: memref<1x16x16xf32, #tpu.memory_space<vmem>>) attributes {dimension_semantics = [#tpu.dimension_semantics<parallel>], iteration_bounds = array<i64: 2>, scalar_prefetch = 0 : i64, scratch_operands = 0 : i64, tpu.core_type = #tpu.core_type<tc>, window_params = [{transform_indices = @transform_0, window_bounds = array<i64: 1, 16, 16>}, {transform_indices = @transform_1, window_bounds = array<i64: 1, 16, 16>}]} {
    %c0 = arith.constant 0 : index
    %c0_0 = arith.constant 0 : index
    %c0_1 = arith.constant 0 : index
    %0 = vector.load %arg1[%c0, %c0_0, %c0_1] : memref<1x16x16xf32, #tpu.memory_space<vmem>>, vector<1x16x16xf32>
    %cst = arith.constant 0.0166666675 : f32
    %1 = vector.broadcast %cst : f32 to vector<1x16x16xf32>
    %2 = arith.cmpf olt, %0, %1 : vector<1x16x16xf32>
    %3 = arith.extui %2 : vector<1x16x16xi1> to vector<1x16x16xi32>
    %4 = arith.sitofp %3 : vector<1x16x16xi32> to vector<1x16x16xf32>
    %5 = vector.extract_strided_slice %4 {offsets = [0, 0, 0], sizes = [1, 16, 15], strides = [1, 1, 1]} : vector<1x16x16xf32> to vector<1x16x15xf32>
    %cst_2 = arith.constant 0.000000e+00 : f32
    %6 = vector.broadcast %cst_2 : f32 to vector<1x16x1xf32>
    %7 = tpu.concatenate %6, %5 in 2 : vector<1x16x1xf32>, vector<1x16x15xf32> -> vector<1x16x16xf32>
    %8 = arith.maximumf %4, %7 : vector<1x16x16xf32>
    %9 = vector.extract_strided_slice %4 {offsets = [0, 0, 1], sizes = [1, 16, 15], strides = [1, 1, 1]} : vector<1x16x16xf32> to vector<1x16x15xf32>
    %cst_3 = arith.constant 0.000000e+00 : f32
    %10 = vector.broadcast %cst_3 : f32 to vector<1x16x1xf32>
    %11 = tpu.concatenate %9, %10 in 2 : vector<1x16x15xf32>, vector<1x16x1xf32> -> vector<1x16x16xf32>
    %12 = arith.maximumf %8, %11 : vector<1x16x16xf32>
    %13 = vector.extract_strided_slice %12 {offsets = [0, 0, 0], sizes = [1, 15, 16], strides = [1, 1, 1]} : vector<1x16x16xf32> to vector<1x15x16xf32>
    %cst_4 = arith.constant 0.000000e+00 : f32
    %14 = vector.broadcast %cst_4 : f32 to vector<1x1x16xf32>
    %15 = tpu.concatenate %14, %13 in 1 : vector<1x1x16xf32>, vector<1x15x16xf32> -> vector<1x16x16xf32>
    %16 = arith.maximumf %12, %15 : vector<1x16x16xf32>
    %17 = vector.extract_strided_slice %12 {offsets = [0, 1, 0], sizes = [1, 15, 16], strides = [1, 1, 1]} : vector<1x16x16xf32> to vector<1x15x16xf32>
    %cst_5 = arith.constant 0.000000e+00 : f32
    %18 = vector.broadcast %cst_5 : f32 to vector<1x1x16xf32>
    %19 = tpu.concatenate %17, %18 in 1 : vector<1x15x16xf32>, vector<1x1x16xf32> -> vector<1x16x16xf32>
    %20 = arith.maximumf %16, %19 : vector<1x16x16xf32>
    %cst_6 = arith.constant 1.000000e+00 : f32
    %21 = vector.broadcast %cst_6 : f32 to vector<1x16x16xf32>
    %22 = arith.subf %21, %20 : vector<1x16x16xf32>
    %c0_7 = arith.constant 0 : index
    %c0_8 = arith.constant 0 : index
    %c0_9 = arith.constant 0 : index
    %23 = vector.load %arg2[%c0_7, %c0_8, %c0_9] : memref<1x16x16xf32, #tpu.memory_space<vmem>>, vector<1x16x16xf32>
    tpu.vector_store %arg2[%c0_7, %c0_8, %c0_9], %22 {strides = array<i32>} : memref<1x16x16xf32, #tpu.memory_space<vmem>>, vector<1x16x16xf32>,
    return
  }
  func.func @transform_0(%arg0: i32) -> (i32, i32, i32) {
    %c0_i32 = arith.constant 0 : i32
    %c0_i32_0 = arith.constant 0 : i32
    %c0_i32_1 = arith.constant 0 : i32
    return %arg0, %c0_i32, %c0_i32_0 : i32, i32, i32
  }
  func.func @transform_1(%arg0: i32) -> (i32, i32, i32) {
    %c0_i32 = arith.constant 0 : i32
    %c0_i32_0 = arith.constant 0 : i32
    %c0_i32_1 = arith.constant 0 : i32
    return %arg0, %c0_i32, %c0_i32_0 : i32, i32, i32
  }
}

</mosaic_0001>

<bundles_post_ra>
// kernel: tpu_custom_call.1
= control target key start
LH: loop header
LB: loop body
LE: loop exit
PB: predicated region body
PF: predicated region fallthrough
CT: control target
= control target key end

     0   :  { %6 = vsyncpa [#allocation3], 0  ;;  %s643_s0 = inlined_call_operand.hbm [shape: f32[2,16,16], index: 0, kind: input, shape index: {}]   ;;  %s644_s1 = inlined_call_operand.hbm [shape: f32[2,16,16], index: 1, kind: output, shape index: {}]  }
   0x1   :  { %8 = vsyncpa [#allocation3 + $0x1], 0 }
   0x2   :  { %9 = vsyncpa [#allocation4], 0 }
   0x3   :  { %11 = vsyncpa [#allocation4 + $0x1], 0  ;;  %s477_s6 = smov 0   ;;  %s479_s7 = smov 0  }
   0x4   :  { %s481_s8 = smov 0   ;;  %s483_s9 = smov 0  }
   0x5 LB: > { %s498_s10 = sadd.s32 4294967295, %s456_s9   ;;  %s279_s11 = sadd.s32 4294967294, %s456_s9   ;;  %s456_s9 = sphi %s483_s9, %s657_s9   ;;  %s452_s8 = sphi %s481_s8, %s656_s8   ;;  %s448_s7 = sphi %s479_s7, %s655_s7   ;;  %s444_s6 = sphi %s477_s6, %s654_s6  }
   0x6   : > { %s502_s12 = sadd.s32 1, %s456_s9   ;;  %s24_s13 = sadd.s32 1, %s452_s8 }
   0x7   : > { %s21_s14 = ssub.s32 %s456_s9, %s502_s12  ;;  %p31_p0 = scmp.ne.s32.totalorder %s452_s8, %s448_s7 }
   0x8   : > { %p22_p1 = scmp.eq.s32.totalorder %s21_s14, 0  ;;  %p32_p2 = scmp.eq.s32.totalorder %s456_s9, 0 }
   0x9   : > { %p37_p3 = scmp.ne.s32.totalorder %s448_s7, %s444_s6  ;;  %p38_p4 = scmp.eq.s32.totalorder %s498_s10, 0 }
   0xa   : > { %s514_s15 = scalar_select %p22_p1, %s452_s8, %s24_s13  }
   0xb   : > { %p516_p5 = por %p32_p2, %p31_p0  ;;  %p520_p6 = por %p38_p4, %p37_p3 }
   0xc   : > { %p61_p7 = scmp.eq.s32.totalorder %s498_s10, 1  ;;  %p67_p8 = scmp.eq.s32.totalorder %s279_s11, 1 }
   0xd   : > { %p309_p10 = scmp.lt.s32.totalorder %s456_s9, 2  ;;  %s87_s20 = sand.u32 1, %s452_s8  }
   0xe   : > { %p527_p11 = por %p61_p7, %p31_p0  ;;  %p531_p12 = por %p67_p8, %p37_p3 }
   0xf   : > { %s295_s21 = sshll.u32 %s456_s9, 8  ;;  %s282_s22 = sshll.u32 %s87_s20, 4 }
  0x10   : > { %s648_s18 = scalar_select %p527_p11, 1, 0 }
  0x11   : > { %s649_s19 = scalar_select %p531_p12, 1, 0 }
  0x12   : > { %s540_s25 = scalar_lea.hbm %s643_s0, %s295_s21  ;;  %s91_s26 = scalar_lea.vmem [#allocation2], %s282_s22 }
  0x13   : > { %s98_s27 = sshll.u32 %s91_s26, 4  ;;  %p544_p13 = pnand %p309_p10, %p516_p5  ;;  %s548_s27 = int_to_ptr.vmem [resolvable:$true] %s98_s27 }
  0x14   : > { %s550_s29 = scalar_lea.sflag [#allocation3], %s87_s20  ;;  %s360_s30 = scalar_lea.hbm %s540_s25, 256 }
  0x15   : > { %p361_p0 = scmp.ne.s32.totalorder %s540_s25, %s360_s30  ;;  %p362_p1 = pneg %p544_p13 }
  0x16   : > { %s365_s4 = scalar_lea.hbm %s643_s0, 512  ;;  %p366_p4 = scmp.lt.u32.totalorder %s540_s25, %s643_s0 }
  0x17   : > { %p363_p2 = pnand %p362_p1, %p361_p0  ;;  %p367_p5 = scmp.lt.u32.totalorder %s365_s4, %s360_s30 }
  0x18   : > { %p369_p8 = scmp.lt.u32.totalorder %s360_s30, %s540_s25 }
  0x19   : > { %p364_p3 = pneg %p363_p2  ;;  %p368_p7 = por %p367_p5, %p366_p4 }
  0x1b   : > { %p370_p10 = por %p369_p8, %p368_p7 }
  0x1d   : > { %p371_p9 = pnand %p370_p10, %p364_p3 }
  0x1f   : > { %374 = shalt.err (!%p371_p9)
}
  0x20   : > { %s375_s13 = scalar_lea.vmem %s548_s27, 256  ;;  %s458_s14 = smov [#allocation2]  }
  0x21   : > { %p376_p0 = scmp.ne.s32.totalorder %s548_s27, %s375_s13  ;;  %s380_s16 = sshll.u32 %s458_s14, 4  ;;  %s381_s16 = int_to_ptr.vmem [resolvable:$false] %s380_s16 }
  0x22   : > { %s382_s20 = scalar_lea.vmem %s381_s16, 512  ;;  %p383_p11 = scmp.lt.s32.totalorder %s548_s27, %s381_s16 }
  0x23   : > { %p378_p2 = pnand %p376_p0, %p362_p1  ;;  %p384_p4 = scmp.lt.s32.totalorder %s382_s20, %s375_s13 }
  0x25   : > { %p379_p12 = pneg %p378_p2  ;;  %p385_p5 = por %p384_p4, %p383_p11 }
  0x27   : > { %p386_p7 = pnand %p385_p5, %p379_p12 }
  0x29   : > { %389 = shalt.err (!%p386_p7)
}
  0x2a   : > { %s459_s21 = smov 128   ;;  %s460_s22 = smov 8  }
  0x2b   : > { %304 = dma.hbm_to_vmem [thread:$0]  (!%p544_p13), %s540_s25, 256, %s548_s27, %s550_s29, %s459_s21, %s459_s21, %s460_s22  }
  0x2c   : > { %p285_p9 = scmp.ge.s32.totalorder %s456_s9, 1  ;;  %p106_p1 = scmp.lt.s32.totalorder %s456_s9, 3 }
  0x2e   : > { %p107_p3 = pnand %p285_p9, %p106_p1 }
  0x2f   : > { %s581_s23 = sand.u32 (!%p107_p3), 1, %s448_s7  }
  0x30   : > { %110 = sbr.rel (%p107_p3) target bundleno = 209 (0xd1), region = 24  ;;  %s286_s24 = sshll.u32 (!%p107_p3), %s581_s23, 4 }
  0x31   : > { %s113_s26 = scalar_lea.sflag (!%p107_p3), [#allocation3], %s581_s23  ;;  %s116_s30 = scalar_lea.vmem (!%p107_p3), [#allocation2], %s286_s24 }
  0x37   : > { %435 = dma.done.wait (%p520_p6), %s113_s26, 256  }
  0x38   : > { %437 = vsyncadd (%p520_p6), %s113_s26, 4294967040  ;;  %v135_v0 = vld [vmem:[%s116_s30] sm:$0xff]  ;;  %v136_v1 = vld [vmem:[%s116_s30 + $0x8] sm:$0xff]  ;;  %v461_v2 = vmov 0.0   ;;  %s462_s25 = smov 1   ;;  %s463_s27 = smov 127  }
  0x39   : > { %vm137_vm0 = vcmp.lt.f32.partialorder %v135_v0, 0.016666668  ;;  %vm138_vm1 = vcmp.lt.f32.partialorder %v136_v1, 0.016666668  ;;  %vm151_vm2 = vcmask 7168   ;;  %vm162_vm3 = vcmask 121856  }
  0x3a   : > { %v288_v3 = vsel %vm137_vm0, 1.0, %v461_v2  ;;  %v289_v4 = vsel %vm138_vm1, 1.0, %v461_v2  ;;  %vm169_vm4 = vcmask 1040384   ;;  %vm178_vm5 = vcmask 1046528   ;;  %s296_s17 = sshll.u32 %s498_s10, 8  ;;  %s134_s28 = scalar_lea.vmem [#allocation5], %s286_s24 }
  0x3b   : > { %v350_v5 = vpack.i.bf16 %v289_v4, %v288_v3  ;;  %s206_s29 = sshll.u32 %s134_s28, 4  ;;  %vm189_vm6 = vcmask 130048   ;;  %s597_s4 = scalar_lea.hbm %s644_s1, %s296_s17  ;;  %s599_s29 = int_to_ptr.vmem [resolvable:$true] %s206_s29 }
  0x3c   : > { %s193_s10 = scalar_lea.sflag [#allocation4], %s581_s23  ;;  %s390_s5 = scalar_lea.vmem %s599_s29, 256 }
  0x3d   : > { %351 = vrot.lane.b32.xlu0 %v350_v5, %s462_s25  ;;  %p391_p6 = scmp.ne.s32.totalorder %s599_s29, %s390_s5  ;;  %p651_p11 = scmp.ne.s32.totalorder %s648_s18, 0 }
  0x3e   : > { %s464_s11 = smov [#allocation5]  }
  0x3f   : > { %p392_p12 = pnand %p391_p6, %p651_p11  ;;  %s394_s13 = sshll.u32 %s464_s11, 4  ;;  %s395_s13 = int_to_ptr.vmem [resolvable:$false] %s394_s13 }
  0x40   : > { %s396_s14 = scalar_lea.vmem %s395_s13, 512  ;;  %p397_p8 = scmp.lt.s32.totalorder %s599_s29, %s395_s13 }
  0x41   : > { %356 = vrot.lane.b32.xlu0 %v350_v5, %s463_s27  ;;  %p393_p13 = pneg %p392_p12  ;;  %p398_p10 = scmp.lt.s32.totalorder %s396_s14, %s390_s5 }
  0x43   : > { %p399_p0 = por %p398_p10, %p397_p8 }
  0x45   : > { %p400_p2 = pnand %p399_p0, %p393_p13 }
  0xaf   : > { %v352_v6 = vpop.permute.xlu0 %351 }
  0xb0   : > { %v354_v7 = vunpack.i.h.bf16 %v352_v6  ;;  %v353_v8 = vunpack.i.l.bf16 %v352_v6 }
  0xb2   : > { %v153_v9 = vsel %vm151_vm2, 0.0, %v354_v7  ;;  %v152_v10 = vsel %vm151_vm2, 0.0, %v353_v8 }
  0xb3   : > { %v357_v11 = vpop.permute.xlu0 %356  ;;  %v155_v14 = vmax.f32 %v289_v4, %v153_v9  ;;  %v154_v15 = vmax.f32 %v288_v3, %v152_v10 }
  0xb4   : > { %v359_v12 = vunpack.i.h.bf16 %v357_v11  ;;  %v358_v13 = vunpack.i.l.bf16 %v357_v11 }
  0xb6   : > { %v164_v16 = vsel %vm162_vm3, %v359_v12, 0.0  ;;  %v163_v17 = vsel %vm162_vm3, %v358_v13, 0.0 }
  0xb7   : > { %v165_v18 = vmax.f32 %v154_v15, %v163_v17  ;;  %v166_v19 = vmax.f32 %v155_v14, %v164_v16 }
  0xb9   : > { %v170_v20 = vrot.slane %v165_v18, 7  ;;  %v171_v21 = vrot.slane %v166_v19, 7  ;;  %v179_v22 = vrot.slane %v165_v18, 1  ;;  %v180_v23 = vrot.slane %v166_v19, 1 }
  0xbb   : > { %v172_v24 = vsel %vm169_vm4, %v170_v20, %v171_v21  ;;  %v175_v25 = vsel %vm169_vm4, 0.0, %v170_v20  ;;  %v181_v28 = vsel %vm178_vm5, %v179_v22, %v180_v23  ;;  %v184_v29 = vsel %vm178_vm5, %v180_v23, 0.0 }
  0xbc   : > { %v176_v26 = vmax.f32 %v165_v18, %v175_v25  ;;  %v177_v27 = vmax.f32 %v166_v19, %v172_v24 }
  0xbe   : > { %v185_v30 = vmax.f32 %v176_v26, %v181_v28  ;;  %v186_v31 = vmax.f32 %v177_v27, %v184_v29 }
  0xc0   : > { %v187_v32 = vsub.f32 1.0, %v185_v30  ;;  %v188_v33 = vsub.f32 1.0, %v186_v31 }
  0xc2   : > { %190 = vst.msk [vmem:[%s134_s28] sm:$0xff] %vm189_vm6, %v187_v32  ;;  %191 = vst.msk [vmem:[%s134_s28 + $0x8] sm:$0xff] %vm189_vm6, %v188_v33 }
  0xc3   : > { %403 = shalt.err (!%p400_p2)
}
  0xc4   : > { %s404_s16 = scalar_lea.hbm %s597_s4, 256  ;;  %s408_s22 = scalar_lea.hbm %s644_s1, 512 }
  0xc5   : > { %p405_p4 = scmp.ne.s32.totalorder %s597_s4, %s404_s16  ;;  %p409_p9 = scmp.lt.u32.totalorder %s597_s4, %s644_s1 }
  0xc6   : > { %p410_p1 = scmp.lt.u32.totalorder %s408_s22, %s404_s16  ;;  %p412_p6 = scmp.lt.u32.totalorder %s404_s16, %s597_s4 }
  0xc7   : > { %p406_p5 = pnand %p405_p4, %p651_p11 }
  0xc8   : > { %p411_p3 = por %p410_p1, %p409_p9 }
  0xc9   : > { %p407_p7 = pneg %p406_p5 }
  0xca   : > { %p413_p12 = por %p412_p6, %p411_p3 }
  0xcc   : > { %p414_p13 = pnand %p413_p12, %p407_p7 }
  0xce   : > { %417 = shalt.err (!%p414_p13)
}
  0xcf   : > { %s465_s30 = smov 128   ;;  %s466_s25 = smov 8  }
  0xd0   : > { %299 = dma.vmem_to_hbm [thread:$0]  (%p651_p11), %s599_s29, 256, %s597_s4, %s193_s10, %s465_s30, %s465_s30, %s466_s25  }
  0xd1 PF: > { %s221_s27 = sand.u32 1, %s444_s6   ;;  %p652_p8 = scmp.ne.s32.totalorder %s649_s19, 0 }
  0xd2   : > { %p653_p10 = scmp.ge.s32.totalorder %s456_s9, 2  ;;  %s222_s17 = scalar_lea.sflag [#allocation4], %s221_s27 }
  0xd4   : > { %p306_p0 = pnand %p653_p10, %p652_p8 }
  0xd6   : > { %439 = dma.done.wait (!%p306_p0), %s222_s17, 256  }
  0xd7   : > { %441 = vsyncadd (!%p306_p0), %s222_s17, 4294967040  ;;  %p14_p2 = scmp.ge.s32.totalorder %s502_s12, 4   ;;  %s654_s6 = smov %s448_s7 }
  0xd8   : > { %s655_s7 = smov %s452_s8  ;;  %s656_s8 = smov %s514_s15 }
  0xd9   : > { %s657_s9 = smov %s502_s12  ;;  %16 = sbr.rel (!%p14_p2) target bundleno = 5 (0x5), region = 69 }
  0xe0   :  { %227 = vsyncpa [#allocation3], 1 }
  0xe1   :  { %229 = vsyncpa [#allocation3 + $0x1], 1 }
  0xe2   :  { %230 = vsyncpa [#allocation4], 1 }
  0xe3   :  { %232 = vsyncpa [#allocation4 + $0x1], 1 }

</bundles_post_ra>
